<compile_context>
chip_gen: v7x
topology: tpu7x:2x2x1
jax: 0.10.0
libtpu: 0.0.40
codegen_flags: <defaults>
</compile_context>

<pallas_src>
import functools

import jax
import jax.numpy as jnp
from jax.experimental import pallas as pl
from jax.experimental.pallas import tpu as pltpu


def _mbv3_kernel(x_ref, w1_ref, b1_ref, wd_ref, bd_ref, w2_ref, b2_ref, o_ref,
                 *, H, W, use_res):
    # x_ref block: (1, Cin, H*W), channel-major, lane-dense in H*W.
    x = x_ref[0]                                    # (Cin, HW) f32
    HW = H * W
    hid = w1_ref.shape[0]

    # ---- 1x1 expand conv + ReLU6:  (hid, Cin) @ (Cin, HW) -------------------
    t = jnp.dot(w1_ref[...], x, preferred_element_type=jnp.float32)
    t = jnp.clip(t + b1_ref[...], 0.0, 6.0)         # (hid, HW)
    # TODO(synk): on v6e/v7x the depthwise taps below could be computed in bf16
    # (halves vreg pressure); kept f32 so a single code path stays exact on v5e.

    # ---- 3x3 depthwise conv, stride 1, pad 1 (roll along lanes + edge masks) -
    pos = jax.lax.broadcasted_iota(jnp.int32, (1, HW), 1)
    col = pos % W
    row_ok = {-1: pos >= W, 0: None, 1: pos < (H - 1) * W}
    col_ok = {-1: col >= 1, 0: None, 1: col <= W - 2}

    acc = jnp.zeros((hid, HW), jnp.float32)
    for dy in (-1, 0, 1):
        for dx in (-1, 0, 1):
            k = (dy + 1) * 3 + (dx + 1)
            w_k = wd_ref[k]                          # (hid, 1) per-channel weight
            shift = (-(dy * W + dx)) % HW            # static; rolled[p] = t[p + dy*W + dx]
            tap = t if shift == 0 else pltpu.roll(t, shift=shift, axis=1)
            mask = row_ok[dy]
            if col_ok[dx] is not None:
                mask = col_ok[dx] if mask is None else jnp.logical_and(mask, col_ok[dx])
            if mask is not None:
                tap = jnp.where(mask, tap, 0.0)      # zero the wrap-around halo
            acc = acc + tap * w_k
    acc = jnp.clip(acc + bd_ref[...], 0.0, 6.0)      # (hid, HW)

    # ---- 1x1 project conv:  (oup, hid) @ (hid, HW) ---------------------------
    y = jnp.dot(w2_ref[...], acc, preferred_element_type=jnp.float32)
    y = y + b2_ref[...]                              # (oup, HW)

    # ---- residual (valid because inp == oup) ---------------------------------
    if use_res:
        y = y + x
    o_ref[0] = y


def mobilev3_block(x_nchw, params, *, use_res):
    """x_nchw: (B, Cin, H, W) float32.  Returns (B, Cout, H, W)."""
    w1t, b1, wd, bd, w2t, b2 = params
    B, Cin, H, W = x_nchw.shape
    hid = w1t.shape[0]
    oup = w2t.shape[0]
    if use_res and Cin != oup:
        raise ValueError("residual connection requires inp == oup")
    HW = H * W

    # Channel-major view: last dim = H*W (lane-dense).  Pure reshape, no transpose.
    x_flat = x_nchw.reshape(B, Cin, HW)

    full = lambda shape: pl.BlockSpec(shape, lambda b: (0,) * len(shape))

    # TODO(synk): at real MobileNetV3 resolutions, tile H into row strips with a
    # 1-row halo instead of a full image per grid step (v7x VMEM is 64 MiB).
    out_flat = pl.pallas_call(
        functools.partial(_mbv3_kernel, H=H, W=W, use_res=use_res),
        out_shape=jax.ShapeDtypeStruct((B, oup, HW), jnp.float32),
        grid_spec=pltpu.PrefetchScalarGridSpec(
            num_scalar_prefetch=0,
            grid=(B,),                     # "parallel" -> both TCs used on v7x
            in_specs=[
                pl.BlockSpec((1, Cin, HW), lambda b: (b, 0, 0)),
                full((hid, Cin)),          # w1^T  (expand)
                full((hid, 1)),            # b1
                full((9, hid, 1)),         # depthwise weights, tap-major
                full((hid, 1)),            # bd
                full((oup, hid)),          # w2^T  (project)
                full((oup, 1)),            # b2
            ],
            out_specs=pl.BlockSpec((1, oup, HW), lambda b: (b, 0, 0)),
        ),
        compiler_params=pltpu.CompilerParams(
            dimension_semantics=("parallel",)),
    )(x_flat, w1t, b1, wd, bd, w2t, b2)

    return out_flat.reshape(B, oup, H, W)


def reference_forward(x_nchw, params, *, use_res):
    """Independent reference with lax.conv_general_dilated (NHWC)."""
    w1t, b1, wd, bd, w2t, b2 = params
    hid = w1t.shape[0]
    oup = w2t.shape[0]
    x = jnp.transpose(x_nchw, (0, 2, 3, 1))          # NHWC
    dn = ("NHWC", "HWIO", "NHWC")

    t = jax.lax.conv_general_dilated(
        x, w1t.T.reshape(1, 1, -1, hid), (1, 1), "VALID", dimension_numbers=dn)
    t = jnp.clip(t + b1.reshape(1, 1, 1, hid), 0.0, 6.0)

    wdep = wd.reshape(3, 3, 1, hid)                  # HWIO with I=1, groups=hid
    d = jax.lax.conv_general_dilated(t, wdep, (1, 1), "SAME",
                                     dimension_numbers=dn,
                                     feature_group_count=hid)
    d = jnp.clip(d + bd.reshape(1, 1, 1, hid), 0.0, 6.0)

    y = jax.lax.conv_general_dilated(
        d, w2t.T.reshape(1, 1, hid, oup), (1, 1), "VALID", dimension_numbers=dn)
    y = y + b2.reshape(1, 1, 1, oup)
    if use_res:
        y = y + x
    return jnp.transpose(y, (0, 3, 1, 2))


if __name__ == "__main__":
    # Module config: inp = oup = 4, expand_ratio = 6 -> hidden_dim = 24
    B, inp, oup, H, W = 2, 4, 4, 16, 16
    expand_ratio = 6
    hid = inp * expand_ratio
    use_res = (inp == oup)

    key = jax.random.PRNGKey(0)
    ks = jax.random.split(key, 7)
    x = jax.random.normal(ks[0], (B, inp, H, W), jnp.float32)

    # Parameters stored channel-major (PyTorch shapes noted):
    w1t = jax.random.normal(ks[1], (hid, inp), jnp.float32) * 0.1    # (hid,inp,1,1)
    b1 = jax.random.normal(ks[2], (hid, 1), jnp.float32) * 0.1
    wd = jax.random.normal(ks[3], (9, hid, 1), jnp.float32) * 0.1    # (hid,1,3,3) tap-major
    bd = jax.random.normal(ks[4], (hid, 1), jnp.float32) * 0.1
    w2t = jax.random.normal(ks[5], (oup, hid), jnp.float32) * 0.1    # (oup,hid,1,1)
    b2 = jax.random.normal(ks[6], (oup, 1), jnp.float32) * 0.1
    params = (w1t, b1, wd, bd, w2t, b2)

    out = jax.block_until_ready(mobilev3_block(x, params, use_res=use_res))
    ref = jax.block_until_ready(reference_forward(x, params, use_res=use_res))

    assert out.shape == (B, oup, H, W)
    assert jnp.allclose(out, ref, atol=1e-4, rtol=1e-4), \
        f"max abs err {jnp.max(jnp.abs(out - ref))}"

    print("KERNEL_OK")
</pallas_src>

<mosaic_0001>
module attributes {stable_mosaic.version = 11 : i64} {
  func.func @_mbv3_kernel(%arg0: i32, %arg1: memref<1x4x256xf32, #tpu.memory_space<vmem>>, %arg2: memref<24x4xf32, #tpu.memory_space<vmem>>, %arg3: memref<24x1xf32, #tpu.memory_space<vmem>>, %arg4: memref<9x24x1xf32, #tpu.memory_space<vmem>>, %arg5: memref<24x1xf32, #tpu.memory_space<vmem>>, %arg6: memref<4x24xf32, #tpu.memory_space<vmem>>, %arg7: memref<4x1xf32, #tpu.memory_space<vmem>>, %arg8: memref<1x4x256xf32, #tpu.memory_space<vmem>>) attributes {dimension_semantics = [#tpu.dimension_semantics<parallel>], iteration_bounds = array<i64: 2>, scalar_prefetch = 0 : i64, scratch_operands = 0 : i64, tpu.core_type = #tpu.core_type<tc>, window_params = [{transform_indices = @transform_0, window_bounds = array<i64: 1, 4, 256>}, {pipeline_mode = #tpu.pipeline_mode<synchronous>, transform_indices = @transform_1, window_bounds = array<i64: 24, 4>}, {pipeline_mode = #tpu.pipeline_mode<synchronous>, transform_indices = @transform_2, window_bounds = array<i64: 24, 1>}, {pipeline_mode = #tpu.pipeline_mode<synchronous>, transform_indices = @transform_3, window_bounds = array<i64: 9, 24, 1>}, {pipeline_mode = #tpu.pipeline_mode<synchronous>, transform_indices = @transform_4, window_bounds = array<i64: 24, 1>}, {pipeline_mode = #tpu.pipeline_mode<synchronous>, transform_indices = @transform_5, window_bounds = array<i64: 4, 24>}, {pipeline_mode = #tpu.pipeline_mode<synchronous>, transform_indices = @transform_6, window_bounds = array<i64: 4, 1>}, {transform_indices = @transform_7, window_bounds = array<i64: 1, 4, 256>}]} {
    %c0 = arith.constant 0 : index
    %c0_0 = arith.constant 0 : index
    %c0_1 = arith.constant 0 : index
    %0 = vector.load %arg1[%c0, %c0_0, %c0_1] : memref<1x4x256xf32, #tpu.memory_space<vmem>>, vector<1x4x256xf32>
    %1 = vector.shape_cast %0 : vector<1x4x256xf32> to vector<4x256xf32>
    %c0_2 = arith.constant 0 : index
    %c0_3 = arith.constant 0 : index
    %2 = vector.load %arg2[%c0_2, %c0_3] : memref<24x4xf32, #tpu.memory_space<vmem>>, vector<24x4xf32>
    %cst = arith.constant dense<0.000000e+00> : vector<24x256xf32>
    %3 = tpu.matmul %2, %1, %cst {dimension_numbers = #tpu.dot_dimension_numbers<[1], [0], [0], [1], [0, 0, 1, 1], [], []>} : vector<24x4xf32>, vector<4x256xf32>, vector<24x256xf32> -> vector<24x256xf32>
    %c0_4 = arith.constant 0 : index
    %c0_5 = arith.constant 0 : index
    %4 = vector.load %arg3[%c0_4, %c0_5] : memref<24x1xf32, #tpu.memory_space<vmem>>, vector<24x1xf32>
    %5 = vector.broadcast %4 : vector<24x1xf32> to vector<24x256xf32>
    %6 = arith.addf %3, %5 : vector<24x256xf32>
    %cst_6 = arith.constant 0.000000e+00 : f32
    %cst_7 = arith.constant 6.000000e+00 : f32
    %7 = vector.broadcast %cst_6 : f32 to vector<24x256xf32>
    %8 = arith.maximumf %7, %6 : vector<24x256xf32>
    %9 = vector.broadcast %cst_7 : f32 to vector<24x256xf32>
    %10 = arith.minimumf %9, %8 : vector<24x256xf32>
    %11 = tpu.iota {dimensions = array<i32: 1>} : vector<1x256xi32>
    %c16_i32 = arith.constant 16 : i32
    %c0_i32 = arith.constant 0 : i32
    %12 = arith.cmpi eq, %c16_i32, %c0_i32 : i32
    %c1_i32 = arith.constant 1 : i32
    %13 = arith.select %12, %c1_i32, %c16_i32 : i32
    %14 = vector.broadcast %13 : i32 to vector<1x256xi32>
    %15 = arith.remsi %11, %14 : vector<1x256xi32>
    %c0_i32_8 = arith.constant 0 : i32
    %16 = vector.broadcast %c0_i32_8 : i32 to vector<1x256xi32>
    %17 = arith.cmpi ne, %15, %16 : vector<1x256xi32>
    %c0_i32_9 = arith.constant 0 : i32
    %18 = vector.broadcast %c0_i32_9 : i32 to vector<1x256xi32>
    %19 = arith.cmpi slt, %15, %18 : vector<1x256xi32>
    %c0_i32_10 = arith.constant 0 : i32
    %20 = arith.cmpi slt, %13, %c0_i32_10 : i32
    %21 = vector.broadcast %20 : i1 to vector<1x256xi1>
    %22 = vector.broadcast %21 : vector<1x256xi1> to vector<1x256xi1>
    %23 = arith.xori %19, %22 : vector<1x256xi1>
    %24 = arith.andi %23, %17 : vector<1x256xi1>
    %25 = vector.broadcast %13 : i32 to vector<1x256xi32>
    %26 = arith.addi %15, %25 : vector<1x256xi32>
    %27 = arith.select %24, %26, %15 : vector<1x256xi1>, vector<1x256xi32>
    %c16_i32_11 = arith.constant 16 : i32
    %28 = vector.broadcast %c16_i32_11 : i32 to vector<1x256xi32>
    %29 = arith.cmpi sge, %11, %28 : vector<1x256xi32>
    %c240_i32 = arith.constant 240 : i32
    %30 = vector.broadcast %c240_i32 : i32 to vector<1x256xi32>
    %31 = arith.cmpi slt, %11, %30 : vector<1x256xi32>
    %c1_i32_12 = arith.constant 1 : i32
    %32 = vector.broadcast %c1_i32_12 : i32 to vector<1x256xi32>
    %33 = arith.cmpi sge, %27, %32 : vector<1x256xi32>
    %c14_i32 = arith.constant 14 : i32
    %34 = vector.broadcast %c14_i32 : i32 to vector<1x256xi32>
    %35 = arith.cmpi sle, %27, %34 : vector<1x256xi32>
    %cst_13 = arith.constant 0.000000e+00 : f32
    %36 = vector.broadcast %cst_13 : f32 to vector<24x256xf32>
    %c0_14 = arith.constant 0 : index
    %c0_15 = arith.constant 0 : index
    %c0_16 = arith.constant 0 : index
    %37 = vector.load %arg4[%c0_14, %c0_15, %c0_16] : memref<9x24x1xf32, #tpu.memory_space<vmem>>, vector<1x24x1xf32>
    %38 = vector.shape_cast %37 : vector<1x24x1xf32> to vector<24x1xf32>
    %c17_i32 = arith.constant 17 : i32
    %39 = tpu.dynamic_rotate %10 by %c17_i32 dim 1 : vector<24x256xf32>, i32 -> vector<24x256xf32>
    %40 = arith.andi %29, %33 : vector<1x256xi1>
    %cst_17 = arith.constant 0.000000e+00 : f32
    %41 = vector.shape_cast %40 : vector<1x256xi1> to vector<1x256xi1>
    %42 = vector.broadcast %41 : vector<1x256xi1> to vector<24x256xi1>
    %43 = vector.broadcast %cst_17 : f32 to vector<24x256xf32>
    %44 = arith.select %42, %39, %43 : vector<24x256xi1>, vector<24x256xf32>
    %45 = vector.broadcast %38 : vector<24x1xf32> to vector<24x256xf32>
    %46 = arith.mulf %44, %45 : vector<24x256xf32>
    %47 = arith.addf %36, %46 : vector<24x256xf32>
    %c1 = arith.constant 1 : index
    %c0_18 = arith.constant 0 : index
    %c0_19 = arith.constant 0 : index
    %48 = vector.load %arg4[%c1, %c0_18, %c0_19] : memref<9x24x1xf32, #tpu.memory_space<vmem>>, vector<1x24x1xf32>
    %49 = vector.shape_cast %48 : vector<1x24x1xf32> to vector<24x1xf32>
    %c16_i32_20 = arith.constant 16 : i32
    %50 = tpu.dynamic_rotate %10 by %c16_i32_20 dim 1 : vector<24x256xf32>, i32 -> vector<24x256xf32>
    %cst_21 = arith.constant 0.000000e+00 : f32
    %51 = vector.shape_cast %29 : vector<1x256xi1> to vector<1x256xi1>
    %52 = vector.broadcast %51 : vector<1x256xi1> to vector<24x256xi1>
    %53 = vector.broadcast %cst_21 : f32 to vector<24x256xf32>
    %54 = arith.select %52, %50, %53 : vector<24x256xi1>, vector<24x256xf32>
    %55 = vector.broadcast %49 : vector<24x1xf32> to vector<24x256xf32>
    %56 = arith.mulf %54, %55 : vector<24x256xf32>
    %57 = arith.addf %47, %56 : vector<24x256xf32>
    %c2 = arith.constant 2 : index
    %c0_22 = arith.constant 0 : index
    %c0_23 = arith.constant 0 : index
    %58 = vector.load %arg4[%c2, %c0_22, %c0_23] : memref<9x24x1xf32, #tpu.memory_space<vmem>>, vector<1x24x1xf32>
    %59 = vector.shape_cast %58 : vector<1x24x1xf32> to vector<24x1xf32>
    %c15_i32 = arith.constant 15 : i32
    %60 = tpu.dynamic_rotate %10 by %c15_i32 dim 1 : vector<24x256xf32>, i32 -> vector<24x256xf32>
    %61 = arith.andi %29, %35 : vector<1x256xi1>
    %cst_24 = arith.constant 0.000000e+00 : f32
    %62 = vector.shape_cast %61 : vector<1x256xi1> to vector<1x256xi1>
    %63 = vector.broadcast %62 : vector<1x256xi1> to vector<24x256xi1>
    %64 = vector.broadcast %cst_24 : f32 to vector<24x256xf32>
    %65 = arith.select %63, %60, %64 : vector<24x256xi1>, vector<24x256xf32>
    %66 = vector.broadcast %59 : vector<24x1xf32> to vector<24x256xf32>
    %67 = arith.mulf %65, %66 : vector<24x256xf32>
    %68 = arith.addf %57, %67 : vector<24x256xf32>
    %c3 = arith.constant 3 : index
    %c0_25 = arith.constant 0 : index
    %c0_26 = arith.constant 0 : index
    %69 = vector.load %arg4[%c3, %c0_25, %c0_26] : memref<9x24x1xf32, #tpu.memory_space<vmem>>, vector<1x24x1xf32>
    %70 = vector.shape_cast %69 : vector<1x24x1xf32> to vector<24x1xf32>
    %c1_i32_27 = arith.constant 1 : i32
    %71 = tpu.dynamic_rotate %10 by %c1_i32_27 dim 1 : vector<24x256xf32>, i32 -> vector<24x256xf32>
    %cst_28 = arith.constant 0.000000e+00 : f32
    %72 = vector.shape_cast %33 : vector<1x256xi1> to vector<1x256xi1>
    %73 = vector.broadcast %72 : vector<1x256xi1> to vector<24x256xi1>
    %74 = vector.broadcast %cst_28 : f32 to vector<24x256xf32>
    %75 = arith.select %73, %71, %74 : vector<24x256xi1>, vector<24x256xf32>
    %76 = vector.broadcast %70 : vector<24x1xf32> to vector<24x256xf32>
    %77 = arith.mulf %75, %76 : vector<24x256xf32>
    %78 = arith.addf %68, %77 : vector<24x256xf32>
    %c4 = arith.constant 4 : index
    %c0_29 = arith.constant 0 : index
    %c0_30 = arith.constant 0 : index
    %79 = vector.load %arg4[%c4, %c0_29, %c0_30] : memref<9x24x1xf32, #tpu.memory_space<vmem>>, vector<1x24x1xf32>
    %80 = vector.shape_cast %79 : vector<1x24x1xf32> to vector<24x1xf32>
    %81 = vector.broadcast %80 : vector<24x1xf32> to vector<24x256xf32>
    %82 = arith.mulf %10, %81 : vector<24x256xf32>
    %83 = arith.addf %78, %82 : vector<24x256xf32>
    %c5 = arith.constant 5 : index
    %c0_31 = arith.constant 0 : index
    %c0_32 = arith.constant 0 : index
    %84 = vector.load %arg4[%c5, %c0_31, %c0_32] : memref<9x24x1xf32, #tpu.memory_space<vmem>>, vector<1x24x1xf32>
    %85 = vector.shape_cast %84 : vector<1x24x1xf32> to vector<24x1xf32>
    %c255_i32 = arith.constant 255 : i32
    %86 = tpu.dynamic_rotate %10 by %c255_i32 dim 1 : vector<24x256xf32>, i32 -> vector<24x256xf32>
    %cst_33 = arith.constant 0.000000e+00 : f32
    %87 = vector.shape_cast %35 : vector<1x256xi1> to vector<1x256xi1>
    %88 = vector.broadcast %87 : vector<1x256xi1> to vector<24x256xi1>
    %89 = vector.broadcast %cst_33 : f32 to vector<24x256xf32>
    %90 = arith.select %88, %86, %89 : vector<24x256xi1>, vector<24x256xf32>
    %91 = vector.broadcast %85 : vector<24x1xf32> to vector<24x256xf32>
    %92 = arith.mulf %90, %91 : vector<24x256xf32>
    %93 = arith.addf %83, %92 : vector<24x256xf32>
    %c6 = arith.constant 6 : index
    %c0_34 = arith.constant 0 : index
    %c0_35 = arith.constant 0 : index
    %94 = vector.load %arg4[%c6, %c0_34, %c0_35] : memref<9x24x1xf32, #tpu.memory_space<vmem>>, vector<1x24x1xf32>
    %95 = vector.shape_cast %94 : vector<1x24x1xf32> to vector<24x1xf32>
    %c241_i32 = arith.constant 241 : i32
    %96 = tpu.dynamic_rotate %10 by %c241_i32 dim 1 : vector<24x256xf32>, i32 -> vector<24x256xf32>
    %97 = arith.andi %31, %33 : vector<1x256xi1>
    %cst_36 = arith.constant 0.000000e+00 : f32
    %98 = vector.shape_cast %97 : vector<1x256xi1> to vector<1x256xi1>
    %99 = vector.broadcast %98 : vector<1x256xi1> to vector<24x256xi1>
    %100 = vector.broadcast %cst_36 : f32 to vector<24x256xf32>
    %101 = arith.select %99, %96, %100 : vector<24x256xi1>, vector<24x256xf32>
    %102 = vector.broadcast %95 : vector<24x1xf32> to vector<24x256xf32>
    %103 = arith.mulf %101, %102 : vector<24x256xf32>
    %104 = arith.addf %93, %103 : vector<24x256xf32>
    %c7 = arith.constant 7 : index
    %c0_37 = arith.constant 0 : index
    %c0_38 = arith.constant 0 : index
    %105 = vector.load %arg4[%c7, %c0_37, %c0_38] : memref<9x24x1xf32, #tpu.memory_space<vmem>>, vector<1x24x1xf32>
    %106 = vector.shape_cast %105 : vector<1x24x1xf32> to vector<24x1xf32>
    %c240_i32_39 = arith.constant 240 : i32
    %107 = tpu.dynamic_rotate %10 by %c240_i32_39 dim 1 : vector<24x256xf32>, i32 -> vector<24x256xf32>
    %cst_40 = arith.constant 0.000000e+00 : f32
    %108 = vector.shape_cast %31 : vector<1x256xi1> to vector<1x256xi1>
    %109 = vector.broadcast %108 : vector<1x256xi1> to vector<24x256xi1>
    %110 = vector.broadcast %cst_40 : f32 to vector<24x256xf32>
    %111 = arith.select %109, %107, %110 : vector<24x256xi1>, vector<24x256xf32>
    %112 = vector.broadcast %106 : vector<24x1xf32> to vector<24x256xf32>
    %113 = arith.mulf %111, %112 : vector<24x256xf32>
    %114 = arith.addf %104, %113 : vector<24x256xf32>
    %c8 = arith.constant 8 : index
    %c0_41 = arith.constant 0 : index
    %c0_42 = arith.constant 0 : index
    %115 = vector.load %arg4[%c8, %c0_41, %c0_42] : memref<9x24x1xf32, #tpu.memory_space<vmem>>, vector<1x24x1xf32>
    %116 = vector.shape_cast %115 : vector<1x24x1xf32> to vector<24x1xf32>
    %c239_i32 = arith.constant 239 : i32
    %117 = tpu.dynamic_rotate %10 by %c239_i32 dim 1 : vector<24x256xf32>, i32 -> vector<24x256xf32>
    %118 = arith.andi %31, %35 : vector<1x256xi1>
    %cst_43 = arith.constant 0.000000e+00 : f32
    %119 = vector.shape_cast %118 : vector<1x256xi1> to vector<1x256xi1>
    %120 = vector.broadcast %119 : vector<1x256xi1> to vector<24x256xi1>
    %121 = vector.broadcast %cst_43 : f32 to vector<24x256xf32>
    %122 = arith.select %120, %117, %121 : vector<24x256xi1>, vector<24x256xf32>
    %123 = vector.broadcast %116 : vector<24x1xf32> to vector<24x256xf32>
    %124 = arith.mulf %122, %123 : vector<24x256xf32>
    %125 = arith.addf %114, %124 : vector<24x256xf32>
    %c0_44 = arith.constant 0 : index
    %c0_45 = arith.constant 0 : index
    %126 = vector.load %arg5[%c0_44, %c0_45] : memref<24x1xf32, #tpu.memory_space<vmem>>, vector<24x1xf32>
    %127 = vector.broadcast %126 : vector<24x1xf32> to vector<24x256xf32>
    %128 = arith.addf %125, %127 : vector<24x256xf32>
    %cst_46 = arith.constant 0.000000e+00 : f32
    %cst_47 = arith.constant 6.000000e+00 : f32
    %129 = vector.broadcast %cst_46 : f32 to vector<24x256xf32>
    %130 = arith.maximumf %129, %128 : vector<24x256xf32>
    %131 = vector.broadcast %cst_47 : f32 to vector<24x256xf32>
    %132 = arith.minimumf %131, %130 : vector<24x256xf32>
    %c0_48 = arith.constant 0 : index
    %c0_49 = arith.constant 0 : index
    %133 = vector.load %arg6[%c0_48, %c0_49] : memref<4x24xf32, #tpu.memory_space<vmem>>, vector<4x24xf32>
    %cst_50 = arith.constant dense<0.000000e+00> : vector<4x256xf32>
    %134 = tpu.matmul %133, %132, %cst_50 {dimension_numbers = #tpu.dot_dimension_numbers<[1], [0], [0], [1], [0, 0, 1, 1], [], []>} : vector<4x24xf32>, vector<24x256xf32>, vector<4x256xf32> -> vector<4x256xf32>
    %c0_51 = arith.constant 0 : index
    %c0_52 = arith.constant 0 : index
    %135 = vector.load %arg7[%c0_51, %c0_52] : memref<4x1xf32, #tpu.memory_space<vmem>>, vector<4x1xf32>
    %136 = vector.broadcast %135 : vector<4x1xf32> to vector<4x256xf32>
    %137 = arith.addf %134, %136 : vector<4x256xf32>
    %138 = arith.addf %137, %1 : vector<4x256xf32>
    %c0_53 = arith.constant 0 : index
    %c0_54 = arith.constant 0 : index
    %c0_55 = arith.constant 0 : index
    %139 = vector.load %arg8[%c0_53, %c0_54, %c0_55] : memref<1x4x256xf32, #tpu.memory_space<vmem>>, vector<1x4x256xf32>
    %140 = vector.shape_cast %139 : vector<1x4x256xf32> to vector<4x256xf32>
    %141 = vector.shape_cast %138 : vector<4x256xf32> to vector<1x4x256xf32>
    tpu.vector_store %arg8[%c0_53, %c0_54, %c0_55], %141 {strides = array<i32>} : memref<1x4x256xf32, #tpu.memory_space<vmem>>, vector<1x4x256xf32>,
    return
  }
  func.func @transform_0(%arg0: i32) -> (i32, i32, i32) {
    %c0_i32 = arith.constant 0 : i32
    %c0_i32_0 = arith.constant 0 : i32
    %c0_i32_1 = arith.constant 0 : i32
    return %arg0, %c0_i32, %c0_i32_0 : i32, i32, i32
  }
  func.func @transform_1(%arg0: i32) -> (i32, i32) {
    %c0_i32 = arith.constant 0 : i32
    %c0_i32_0 = arith.constant 0 : i32
    %c0_i32_1 = arith.constant 0 : i32
    return %c0_i32, %c0_i32_0 : i32, i32
  }
  func.func @transform_2(%arg0: i32) -> (i32, i32) {
    %c0_i32 = arith.constant 0 : i32
    %c0_i32_0 = arith.constant 0 : i32
    %c0_i32_1 = arith.constant 0 : i32
    return %c0_i32, %c0_i32_0 : i32, i32
  }
  func.func @transform_3(%arg0: i32) -> (i32, i32, i32) {
    %c0_i32 = arith.constant 0 : i32
    %c0_i32_0 = arith.constant 0 : i32
    %c0_i32_1 = arith.constant 0 : i32
    %c0_i32_2 = arith.constant 0 : i32
    return %c0_i32, %c0_i32_0, %c0_i32_1 : i32, i32, i32
  }
  func.func @transform_4(%arg0: i32) -> (i32, i32) {
    %c0_i32 = arith.constant 0 : i32
    %c0_i32_0 = arith.constant 0 : i32
    %c0_i32_1 = arith.constant 0 : i32
    return %c0_i32, %c0_i32_0 : i32, i32
  }
  func.func @transform_5(%arg0: i32) -> (i32, i32) {
    %c0_i32 = arith.constant 0 : i32
    %c0_i32_0 = arith.constant 0 : i32
    %c0_i32_1 = arith.constant 0 : i32
    return %c0_i32, %c0_i32_0 : i32, i32
  }
  func.func @transform_6(%arg0: i32) -> (i32, i32) {
    %c0_i32 = arith.constant 0 : i32
    %c0_i32_0 = arith.constant 0 : i32
    %c0_i32_1 = arith.constant 0 : i32
    return %c0_i32, %c0_i32_0 : i32, i32
  }
  func.func @transform_7(%arg0: i32) -> (i32, i32, i32) {
    %c0_i32 = arith.constant 0 : i32
    %c0_i32_0 = arith.constant 0 : i32
    %c0_i32_1 = arith.constant 0 : i32
    return %arg0, %c0_i32, %c0_i32_0 : i32, i32, i32
  }
}

</mosaic_0001>

<bundles_post_ra>
// kernel: tpu_custom_call.1
= control target key start
LH: loop header
LB: loop body
LE: loop exit
PB: predicated region body
PF: predicated region fallthrough
CT: control target
= control target key end

     0   :  { %12 = vsyncpa [#allocation3], 0  ;;  %s2124_s0 = inlined_call_operand.vmem [shape: f32[2,4,256], index: 0, kind: input, shape index: {}]   ;;  %s2125_s1 = inlined_call_operand.vmem [shape: f32[24,4], index: 1, kind: input, shape index: {}]   ;;  %s2126_s2 = inlined_call_operand.vmem [shape: f32[24,1], index: 2, kind: input, shape index: {}]   ;;  %s2127_s3 = inlined_call_operand.vmem [shape: f32[9,24,1], index: 3, kind: input, shape index: {}]   ;;  %s2128_s4 = inlined_call_operand.vmem [shape: f32[24,1], index: 4, kind: input, shape index: {}]   ;;  %s2129_s5 = inlined_call_operand.vmem [shape: f32[4,24], index: 5, kind: input, shape index: {}]   ;;  %s2130_s6 = inlined_call_operand.vmem [shape: f32[4,1], index: 6, kind: input, shape index: {}]   ;;  %s2131_s7 = inlined_call_operand.hbm [shape: f32[2,4,256], index: 7, kind: output, shape index: {}]  }
   0x1   :  { %14 = vsyncpa [#allocation3 + $0x1], 0  ;;  %s1379_s24 = smov 0   ;;  %s1381_s25 = smov 0  }
   0x2   :  { %s1383_s26 = smov 0   ;;  %s1385_s27 = smov 0  }
   0x3 LB: > { %s1400_s28 = sadd.s32 4294967295, %s1326_s27   ;;  %s1164_s29 = sadd.s32 4294967294, %s1326_s27   ;;  %s1326_s27 = sphi %s1385_s27, %s2190_s27   ;;  %s1322_s26 = sphi %s1383_s26, %s2189_s26   ;;  %s1318_s25 = sphi %s1381_s25, %s2188_s25   ;;  %s1314_s24 = sphi %s1379_s24, %s2187_s24  }
   0x4   : > { %s1404_s30 = sadd.s32 1, %s1326_s27   ;;  %s179_s8 = sadd.s32 1, %s1322_s26 }
   0x5   : > { %s176_s9 = ssub.s32 %s1326_s27, %s1404_s30  ;;  %p189_p0 = scmp.ne.s32.totalorder %s1322_s26, %s1318_s25 }
   0x6   : > { %p177_p1 = scmp.eq.s32.totalorder %s176_s9, 0  ;;  %p190_p2 = scmp.eq.s32.totalorder %s1400_s28, 1 }
   0x7   : > { %p195_p3 = scmp.ne.s32.totalorder %s1318_s25, %s1314_s24  ;;  %p196_p4 = scmp.eq.s32.totalorder %s1164_s29, 1 }
   0x8   : > { %s1415_s10 = scalar_select %p177_p1, %s1322_s26, %s179_s8  }
   0x9   : > { %p1417_p5 = por %p190_p2, %p189_p0  ;;  %p1421_p6 = por %p196_p4, %p195_p3 }
   0xa   : > { %p1167_p7 = scmp.ge.s32.totalorder %s1326_s27, 1  ;;  %p240_p8 = scmp.lt.s32.totalorder %s1326_s27, 3 }
   0xc   : > { %p241_p9 = pnand %p1167_p7, %p240_p8 }
   0xe   : > { %244 = sbr.rel (%p241_p9) target bundleno = 721 (0x2d1), region = 48 }
  0x15   : > { %p272_p10 = scmp.lt.s32.totalorder %s1400_s28, 1  ;;  %v1328_v0 = vmov 0.0   ;;  %v281_v1 = vld [vmem:[%s2126_s2] sm:$0xff]  ;;  %v1329_v2 = vmov 0   ;;  %v282_v3 = vld [vmem:[%s2126_s2 + $0x8] sm:$0xff]  ;;  %v283_v4 = vld [vmem:[%s2126_s2 + $0x10] sm:$0xff] }
  0x16   : > { %380 = vmatprep.mubr.f32.mxu0 %v1328_v0  ;;  %1075 = vmatprep.mubr.f32.mxu1 %v1328_v0  ;;  %vm311_vm0 = vcmask 1043456   ;;  %v446_v7 = vld [vmem:[%s2127_s3] sm:$0xff]  ;;  %vm301_vm1 = vcmask 31744   ;;  %v447_v9 = vld [vmem:[%s2127_s3 + $0x8] sm:$0xff]  ;;  %v1176_v10 = vld [vmem:[%s2127_s3 + $0x18] sm:$0xff]  ;;  %s1330_s18 = smov 16  }
  0x17   : > { %s273_s15 = scalar_select %p272_p10, %s1400_s28, 1  ;;  %1261 = vset.pattern.permute.xlu0 %v1329_v2  ;;  %1262 = vset.pattern.permute.xlu1 %v1329_v2  ;;  %v278_v8 = vld [vmem:[%s2125_s1] sm:$0xff]  ;;  %v279_v11 = vld [vmem:[%s2125_s1 + $0x8] sm:$0xff]  ;;  %v1179_v13 = vld [vmem:[%s2127_s3 + $0x30] sm:$0xff] }
  0x18   : > { %286 = vperm.xlu0 %1261, %v281_v1   ;;  %296 = vperm.xlu1 %1262, %v283_v4   ;;  %v1177_v12 = vld [vmem:[%s2127_s3 + $0x20] sm:$0xff]  ;;  %v1180_v14 = vld [vmem:[%s2127_s3 + $0x38] sm:$0xff]  ;;  %v280_v15 = vld [vmem:[%s2125_s1 + $0x10] sm:$0xff]  ;;  %s1331_s19 = smov 17   ;;  %s1332_s20 = smov 1  }
  0x19   : > { %s1206_s16 = sshll.u32 %s273_s15, 3  ;;  %v1182_v16 = vld [vmem:[%s2127_s3 + $0x48] sm:$0xff]  ;;  %v1183_v17 = vld [vmem:[%s2127_s3 + $0x50] sm:$0xff]  ;;  %v1185_v20 = vld [vmem:[%s2127_s3 + $0x60] sm:$0xff]  ;;  %s1334_s22 = smov 127  }
  0x1a   : > { %s276_s21 = scalar_lea.vmem %s2124_s0, %s1206_s16  ;;  %v448_v18 = vld [vmem:[%s2127_s3 + $0x10] sm:$0xff]  ;;  %v1178_v19 = vld [vmem:[%s2127_s3 + $0x28] sm:$0xff]  ;;  %v1181_v22 = vld [vmem:[%s2127_s3 + $0x40] sm:$0xff]  ;;  %s1335_s23 = smov 113  }
  0x1b   : > { %v1441_v5 = vld [vmem:[%s276_s21] sm:$0xff]  ;;  %v1186_v21 = vld [vmem:[%s2127_s3 + $0x68] sm:$0xff]  ;;  %v1188_v23 = vld [vmem:[%s2127_s3 + $0x78] sm:$0xff]  ;;  %s1333_s21 = smov 15   ;;  %s1336_s29 = smov 112  }
  0x1c   : > { %2145 = vst [vmem:[#allocation5_spill] sm:$0xff] %v1441_v5  ;;  %v1445_v6 = vcombine.high %v1441_v5, %v1441_v5  ;;  %291 = vperm.xlu0 %1261, %v282_v3   ;;  %482 = vperm.xlu1 %1262, %v446_v7   ;;  %v1189_v24 = vld [vmem:[%s2127_s3 + $0x80] sm:$0xff]  ;;  %v1184_v25 = vld [vmem:[%s2127_s3 + $0x58] sm:$0xff]  ;;  %v1191_v26 = vld [vmem:[%s2127_s3 + $0x90] sm:$0xff]  ;;  %s1337_s8 = smov 111  }
  0x1d   : > { %v1192_v27 = vld [vmem:[%s2127_s3 + $0x98] sm:$0xff]  ;;  %v1187_v28 = vld [vmem:[%s2127_s3 + $0x70] sm:$0xff]  ;;  %v1194_v29 = vld [vmem:[%s2127_s3 + $0xa8] sm:$0xff] }
  0x1e   : > { %2146 = vst [vmem:[#allocation6_spill] sm:$0xff] %v1445_v6  ;;  %1171 = vmatprep.subr.msk.mxu0 %vm311_vm0, %v1445_v6  ;;  %v1195_v30 = vld [vmem:[%s2127_s3 + $0xb0] sm:$0xff]  ;;  %v1190_v31 = vld [vmem:[%s2127_s3 + $0x88] sm:$0xff]  ;;  %v1197_v32 = vld [vmem:[%s2127_s3 + $0xc0] sm:$0xff] }
  0x1f   : > { %1172 = vmatpush1.msk.msra.mxu0 %vm311_vm0, %v1441_v5  ;;  %v1198_v33 = vld [vmem:[%s2127_s3 + $0xc8] sm:$0xff]  ;;  %v1193_v34 = vld [vmem:[%s2127_s3 + $0xa0] sm:$0xff]  ;;  %v1196_v35 = vld [vmem:[%s2127_s3 + $0xb8] sm:$0xff] }
  0x20   : > { %1173 = vmatmul.mubr.msk.f32.vlgmr.msra.gmra.mrb[0].mxu0 %vm301_vm1, %v278_v8  ;;  %487 = vperm.xlu0 %1261, %v447_v9   ;;  %v964_v36 = vld [vmem:[%s2128_s4] sm:$0xff]  ;;  %v965_v37 = vld [vmem:[%s2128_s4 + $0x8] sm:$0xff]  ;;  %v1199_v38 = vld [vmem:[%s2127_s3 + $0xd0] sm:$0xff] }
  0x21   : > { %386 = vmatprep.mubr.f32.mxu0 %v1328_v0  ;;  %542 = vperm.xlu1 %1262, %v1176_v10  }
  0x24   : > { %1174 = vmatmul.mubr.msk.f32.gmra.mrb[2].mxu0 %vm301_vm1, %v279_v11  ;;  %547 = vperm.xlu0 %1261, %v1177_v12  }
  0x25   : > { %392 = vmatprep.mubr.f32.mxu0 %v1328_v0  ;;  %604 = vperm.xlu1 %1262, %v1179_v13  }
  0x28   : > { %609 = vperm.xlu0 %1261, %v1180_v14   ;;  %1175 = vmatmul.mubr.msk.f32.gmra.mrb[4].mxu0 %vm301_vm1, %v280_v15 }
  0x29   : > { %664 = vperm.xlu1 %1262, %v1182_v16  }
  0x2c   : > { %669 = vperm.xlu0 %1261, %v1183_v17  }
  0x2d   : > { %492 = vperm.xlu1 %1262, %v448_v18  }
  0x30   : > { %552 = vperm.xlu0 %1261, %v1178_v19  }
  0x31   : > { %695 = vperm.xlu1 %1262, %v1185_v20  }
  0x34   : > { %700 = vperm.xlu0 %1261, %v1186_v21  }
  0x35   : > { %614 = vperm.xlu1 %1262, %v1181_v22  }
  0x38   : > { %755 = vperm.xlu0 %1261, %v1188_v23  }
  0x39   : > { %760 = vperm.xlu1 %1262, %v1189_v24  }
  0x3c   : > { %674 = vperm.xlu0 %1261, %v1184_v25   ;;  %v966_v25 = vld [vmem:[%s2128_s4 + $0x10] sm:$0xff] }
  0x3d   : > { %817 = vperm.xlu1 %1262, %v1191_v26  }
  0x40   : > { %822 = vperm.xlu0 %1261, %v1192_v27  }
  0x41   : > { %705 = vperm.xlu1 %1262, %v1187_v28   ;;  %v1001_v28 = vld [vmem:[%s2130_s6] sm:$0xf] }
  0x44   : > { %877 = vperm.xlu0 %1261, %v1194_v29  }
  0x45   : > { %882 = vperm.xlu1 %1262, %v1195_v30  }
  0x48   : > { %765 = vperm.xlu0 %1261, %v1190_v31  }
  0x49   : > { %939 = vperm.xlu1 %1262, %v1197_v32  }
  0x4c   : > { %944 = vperm.xlu0 %1261, %v1198_v33  }
  0x4d   : > { %827 = vperm.xlu1 %1262, %v1193_v34  }
  0x50   : > { %887 = vperm.xlu0 %1261, %v1196_v35  }
  0x51   : > { %969 = vperm.xlu1 %1262, %v964_v36  }
  0x54   : > { %974 = vperm.xlu0 %1261, %v965_v37  }
  0x55   : > { %949 = vperm.xlu1 %1262, %v1199_v38  }
  0x97   : > { %v287_v39 = vpop.permute.xlu0 %286  ;;  %v297_v53 = vpop.permute.xlu1 %296 }
  0x9b   : > { %v292_v52 = vpop.permute.xlu0 %291  ;;  %v1582_v56 = vpop.permute.xlu1 %482 }
  0x9f   : > { %v1590_v58 = vpop.permute.xlu0 %487 }
  0xa0   : > { %v1596_v59 = vpop.permute.xlu1 %542 }
  0xa3   : > { %v1602_v60 = vpop.permute.xlu0 %547 }
  0xa4   : > { %v1604_v62 = vpop.permute.xlu1 %604 }
  0xa7   : > { %v1610_v0 = vpop.permute.xlu0 %609 }
  0xa8   : > { %v1616_v1 = vpop.permute.xlu1 %664 }
  0xab   : > { %v1624_v3 = vpop.permute.xlu0 %669 }
  0xac   : > { %v1626_v4 = vpop.permute.xlu1 %492 }
  0xaf   : > { %v1632_v8 = vpop.permute.xlu0 %552 }
  0xb0   : > { %v1638_v9 = vpop.permute.xlu1 %695 }
  0xb3   : > { %v1644_v11 = vpop.permute.xlu0 %700 }
  0xb4   : > { %v1646_v12 = vpop.permute.xlu1 %614 }
  0xb7   : > { %v1655_v15 = vpop.permute.xlu0 %755 }
  0xb8   : > { %v1657_v16 = vpop.permute.xlu1 %760 }
  0xbb   : > { %v1667_v18 = vpop.permute.xlu0 %674 }
  0xbc   : > { %v1669_v19 = vpop.permute.xlu1 %817 }
  0xbf   : > { %v1677_v21 = vpop.permute.xlu0 %822 }
  0xc0   : > { %v1679_v22 = vpop.permute.xlu1 %705 }
  0xc3   : > { %v1689_v23 = vpop.permute.xlu0 %877 }
  0xc4   : > { %v1691_v24 = vpop.permute.xlu1 %882 }
  0xc7   : > { %v1700_v26 = vpop.permute.xlu0 %765 }
  0xc8   : > { %2148 = vst [vmem:[#allocation8_spill] sm:$0xff] %v1700_v26  ;;  %v1702_v27 = vpop.permute.xlu1 %939 }
  0xcb   : > { %v1711_v29 = vpop.permute.xlu0 %944 }
  0xcc   : > { %v1713_v30 = vpop.permute.xlu1 %827 }
  0xcd   : > { %2149 = vst [vmem:[#allocation9_spill] sm:$0xff] %v1713_v30 }
  0xcf   : > { %v1715_v31 = vpop.permute.xlu0 %887 }
  0xd0   : > { %2150 = vst [vmem:[#allocation10_spill] sm:$0xff] %v1715_v31  ;;  %v1717_v32 = vpop.permute.xlu1 %969 }
  0xd3   : > { %v1719_v33 = vpop.permute.xlu0 %974 }
  0xd4   : > { %v1721_v34 = vpop.permute.xlu1 %949 }
  0xd5   : > { %2151 = vst [vmem:[#allocation11_spill] sm:$0xff] %v1721_v34 }
  0xf3   : > { %v382_v40 = vpop.f32.mrb[0].mxu0 }
  0xf4   : > { %v383_v41 = vadd.f32 %v382_v40, %v287_v39  ;;  %v384_v42 = vpop.f32.mrb[1].mxu0 }
  0xf5   : > { %v385_v49 = vadd.f32 %v384_v42, %v287_v39  ;;  %v411_v39 = vlaneseq }
  0xf6   : > { %v399_v43 = vmax.f32 %v383_v41, 0.0 }
  0xf7   : > { %v388_v44 = vpop.f32.mrb[2].mxu0  ;;  %v400_v50 = vmax.f32 %v385_v49, 0.0  ;;  %v1725_v42 = vand.u32 127, %v411_v39 }
  0xf8   : > { %v1548_v45 = vmin.f32 %v399_v43, 6.0  ;;  %v390_v46 = vpop.f32.mrb[3].mxu0  ;;  %v389_v54 = vadd.f32 %v388_v44, %v292_v52 }
  0xf9   : > { %v1568_v51 = vmin.f32 %v400_v50, 6.0  ;;  %v391_v61 = vadd.f32 %v390_v46, %v292_v52  ;;  %v1732_v46 = vadd.s32 128, %v1725_v42  ;;  %vm438_vm2 = vcmp.ge.s32.totalorder %v1725_v42, 16 }
  0xfa   : > { %511 = vrot.lane.b32.xlu0 %v1548_v45, %s1330_s18  ;;  %449 = vrot.lane.b32.xlu1 %v1548_v45, %s1331_s19  ;;  %v401_v55 = vmax.f32 %v389_v54, 0.0  ;;  %vm523_vm3 = vcmp.lt.s32.totalorder %v1725_v42, 16  ;;  %vm461_vm5 = vcmp.lt.s32.totalorder %v1725_v42, 17  ;;  %vm2142_vm7 = vcmp.lt.s32.totalorder %v1725_v42, 15 }
  0xfb   : > { %v394_v47 = vpop.f32.mrb[4].mxu0  ;;  %v402_v63 = vmax.f32 %v391_v61, 0.0  ;;  %v425_v49 = vand.u32 15, %v1732_v46  ;;  %vm2141_vm12 = vcmp.lt.s32.totalorder %v1725_v42, 1  ;;  %vm2139_vm13 = vcmp.lt.s32.totalorder %v1725_v42, 127 }
  0xfc   : > { %v1554_v48 = vpop.f32.mrb[5].mxu0  ;;  %v1588_v57 = vmin.f32 %v401_v55, 6.0  ;;  %v395_v7 = vadd.f32 %v394_v47, %v297_v53  ;;  %v418_v47 = vand.u32 15, %v1725_v42  ;;  %vm441_vm14 = vcmp.lt.s32.totalorder %v1732_v46, 240 }
  0xfd   : > { %v1618_v2 = vmin.f32 %v402_v63, 6.0  ;;  %v397_v14 = vadd.f32 %v1554_v48, %v297_v53  ;;  %vm1750_vm8 = vcmp.ge.s32.totalorder %v425_v49, 1  ;;  %vm1766_vm10 = vcmp.le.s32.totalorder %v425_v49, 14 }
  0xfe   : > { %633 = vrot.lane.b32.xlu0 %v1548_v45, %s1332_s20  ;;  %571 = vrot.lane.b32.xlu1 %v1548_v45, %s1333_s21  ;;  %v403_v10 = vmax.f32 %v395_v7, 0.0  ;;  %vm1738_vm4 = vcmp.ge.s32.totalorder %v418_v47, 1  ;;  %vm1743_vm6 = vcmp.le.s32.totalorder %v418_v47, 14  ;;  %vm796_vm15 = vcmp.lt.s32.totalorder %v1725_v42, 113  ;;  %vm1833_vm1 = vmand %vm441_vm14, %vm1750_vm8 }
  0xff   : > { %v404_v17 = vmax.f32 %v397_v14, 0.0  ;;  %vm1758_vm9 = vmand %vm438_vm2, %vm1738_vm4  ;;  %vm2140_vm0 = vcmp.lt.s32.totalorder %v1725_v42, 112 }
 0x100   : > { %v1648_v13 = vmin.f32 %v403_v10, 6.0  ;;  %vm1774_vm11 = vmand %vm438_vm2, %vm1743_vm6 }
 0x101   : > { %v1671_v20 = vmin.f32 %v404_v17, 6.0 }
 0x102   : > { %724 = vrot.lane.b32.xlu0 %v1548_v45, %s1334_s22  ;;  %784 = vrot.lane.b32.xlu1 %v1548_v45, %s1335_s23 }
 0x103   : > { %2147 = vst [vmem:[#allocation7_spill] sm:$0xff] %v1671_v20 }
 0x106   : > { %846 = vrot.lane.b32.xlu0 %v1548_v45, %s1336_s29  ;;  %906 = vrot.lane.b32.xlu1 %v1548_v45, %s1337_s8 }
 0x10a   : > { %517 = vrot.lane.b32.xlu0 %v1568_v51, %s1330_s18  ;;  %455 = vrot.lane.b32.xlu1 %v1568_v51, %s1331_s19 }
 0x10e   : > { %639 = vrot.lane.b32.xlu0 %v1568_v51, %s1332_s20  ;;  %577 = vrot.lane.b32.xlu1 %v1568_v51, %s1333_s21 }
 0x112   : > { %730 = vrot.lane.b32.xlu0 %v1568_v51, %s1334_s22  ;;  %790 = vrot.lane.b32.xlu1 %v1568_v51, %s1335_s23 }
 0x116   : > { %852 = vrot.lane.b32.xlu0 %v1568_v51, %s1336_s29  ;;  %912 = vrot.lane.b32.xlu1 %v1568_v51, %s1337_s8 }
 0x11a   : > { %451 = vrot.lane.b32.xlu0 %v1588_v57, %s1331_s19  ;;  %513 = vrot.lane.b32.xlu1 %v1588_v57, %s1330_s18 }
 0x11e   : > { %573 = vrot.lane.b32.xlu0 %v1588_v57, %s1333_s21  ;;  %635 = vrot.lane.b32.xlu1 %v1588_v57, %s1332_s20 }
 0x122   : > { %786 = vrot.lane.b32.xlu0 %v1588_v57, %s1335_s23  ;;  %726 = vrot.lane.b32.xlu1 %v1588_v57, %s1334_s22 }
 0x126   : > { %908 = vrot.lane.b32.xlu0 %v1588_v57, %s1337_s8  ;;  %848 = vrot.lane.b32.xlu1 %v1588_v57, %s1336_s29 }
 0x12a   : > { %457 = vrot.lane.b32.xlu0 %v1618_v2, %s1331_s19  ;;  %519 = vrot.lane.b32.xlu1 %v1618_v2, %s1330_s18 }
 0x12e   : > { %579 = vrot.lane.b32.xlu0 %v1618_v2, %s1333_s21  ;;  %641 = vrot.lane.b32.xlu1 %v1618_v2, %s1332_s20 }
 0x132   : > { %792 = vrot.lane.b32.xlu0 %v1618_v2, %s1335_s23  ;;  %732 = vrot.lane.b32.xlu1 %v1618_v2, %s1334_s22 }
 0x136   : > { %914 = vrot.lane.b32.xlu0 %v1618_v2, %s1337_s8  ;;  %854 = vrot.lane.b32.xlu1 %v1618_v2, %s1336_s29 }
 0x13a   : > { %575 = vrot.lane.b32.xlu0 %v1648_v13, %s1333_s21  ;;  %453 = vrot.lane.b32.xlu1 %v1648_v13, %s1331_s19 }
 0x13e   : > { %788 = vrot.lane.b32.xlu0 %v1648_v13, %s1335_s23  ;;  %515 = vrot.lane.b32.xlu1 %v1648_v13, %s1330_s18 }
 0x142   : > { %850 = vrot.lane.b32.xlu0 %v1648_v13, %s1336_s29  ;;  %637 = vrot.lane.b32.xlu1 %v1648_v13, %s1332_s20 }
 0x146   : > { %459 = vrot.lane.b32.xlu0 %v1671_v20, %s1331_s19  ;;  %728 = vrot.lane.b32.xlu1 %v1648_v13, %s1334_s22 }
 0x14a   : > { %521 = vrot.lane.b32.xlu0 %v1671_v20, %s1330_s18  ;;  %581 = vrot.lane.b32.xlu1 %v1671_v20, %s1333_s21  ;;  %s269_s18 = sand.u32 1, %s1318_s25  }
 0x14b   : > { %s1168_s19 = sshll.u32 %s269_s18, 3  ;;  %s1091_s9 = scalar_lea.sflag [#allocation3], %s269_s18 }
 0x14c   : > { %s271_s21 = scalar_lea.vmem [#allocation2], %s1168_s19 }
 0x14e   : > { %643 = vrot.lane.b32.xlu0 %v1671_v20, %s1332_s20  ;;  %794 = vrot.lane.b32.xlu1 %v1671_v20, %s1335_s23  ;;  %s1207_s20 = sshll.u32 %s1400_s28, 7  ;;  %s1338_s28 = smov [#allocation2]  }
 0x14f   : > { %s1268_s14 = sshll.u32 %s1338_s28, 4  ;;  %s1269_s14 = int_to_ptr.vmem [resolvable:$false] %s1268_s14 }
 0x150   : > { %s1270_s15 = scalar_lea.vmem %s1269_s14, 256 }
 0x152   : > { %734 = vrot.lane.b32.xlu0 %v1671_v20, %s1334_s22  ;;  %856 = vrot.lane.b32.xlu1 %v1671_v20, %s1336_s29  ;;  %s1105_s22 = sshll.u32 %s271_s21, 4  ;;  %s2084_s22 = int_to_ptr.vmem [resolvable:$true] %s1105_s22 }
 0x153   : > { %s1264_s13 = scalar_lea.vmem %s2084_s22, 128  ;;  %p1271_p0 = scmp.lt.s32.totalorder %s2084_s22, %s1269_s14 }
 0x154   : > { %p1265_p11 = scmp.ne.s32.totalorder %s2084_s22, %s1264_s13  ;;  %p1272_p1 = scmp.lt.s32.totalorder %s1270_s15, %s1264_s13 }
 0x156   : > { %979 = vperm.xlu0 %1261, %v966_v25   ;;  %910 = vrot.lane.b32.xlu1 %v1648_v13, %s1337_s8  ;;  %p1266_p12 = pnand %p1265_p11, %p1417_p5  ;;  %p1273_p2 = por %p1272_p1, %p1271_p0 }
 0x158   : > { %p1267_p13 = pneg %p1266_p12 }
 0x15a   : > { %916 = vrot.lane.b32.xlu0 %v1671_v20, %s1337_s8  ;;  %1004 = vperm.xlu1 %1262, %v1001_v28   ;;  %s2082_s8 = scalar_lea.hbm %s2131_s7, %s1207_s20  ;;  %p1274_p3 = pnand %p1273_p2, %p1267_p13 }
 0x16c   : > { %v512_v35 = vpop.permute.xlu0 %511  ;;  %v450_v36 = vpop.permute.xlu1 %449 }
 0x170   : > { %v634_v37 = vpop.permute.xlu0 %633  ;;  %v572_v38 = vpop.permute.xlu1 %571 }
 0x174   : > { %v725_v40 = vpop.permute.xlu0 %724  ;;  %v1723_v41 = vpop.permute.xlu1 %784 }
 0x178   : > { %v1727_v43 = vpop.permute.xlu0 %846  ;;  %v1729_v44 = vpop.permute.xlu1 %906 }
 0x17c   : > { %v518_v48 = vpop.permute.xlu0 %517  ;;  %v456_v50 = vpop.permute.xlu1 %455 }
 0x17d   : > { %v527_v54 = vsel %vm523_vm3, %v518_v48, %v512_v35  ;;  %v462_v63 = vsel %vm461_vm5, %v450_v36, %v456_v50  ;;  %v465_v7 = vsel %vm461_vm5, %v456_v50, %v450_v36  ;;  %v524_v39 = vsel %vm523_vm3, %v512_v35, %v518_v48 }
 0x17e   : > { %v534_v47 = vsel %vm438_vm2, %v527_v54, 0.0  ;;  %v474_v49 = vsel %vm1758_vm9, %v465_v7, 0.0  ;;  %v475_v50 = vsel %vm1750_vm8, %v462_v63, 0.0  ;;  %v556_v48 = vmul.f32 %v1596_v59, %v524_v39 }
 0x17f   : > { %v555_v35 = vmul.f32 %v1596_v59, %v534_v47  ;;  %v495_v54 = vmul.f32 %v1582_v56, %v474_v49  ;;  %v496_v7 = vmul.f32 %v1582_v56, %v475_v50 }
 0x180   : > { %v640_v10 = vpop.permute.xlu0 %639  ;;  %v578_v14 = vpop.permute.xlu1 %577 }
 0x181   : > { %v584_v28 = vsel %vm2142_vm7, %v572_v38, %v578_v14  ;;  %v587_v36 = vsel %vm2142_vm7, %v578_v14, %v572_v38  ;;  %v646_v63 = vsel %vm2141_vm12, %v634_v37, %v640_v10  ;;  %v649_v14 = vsel %vm2141_vm12, %v640_v10, %v634_v37 }
 0x182   : > { %v596_v34 = vsel %vm1774_vm11, %v587_v36, 0.0  ;;  %v597_v38 = vsel %vm1766_vm10, %v584_v28, 0.0  ;;  %v561_v26 = vadd.f32 %v555_v35, %v495_v54  ;;  %v562_v47 = vadd.f32 %v556_v48, %v496_v7 }
 0x183   : > { %v617_v31 = vmul.f32 %v1604_v62, %v596_v34  ;;  %v618_v36 = vmul.f32 %v1604_v62, %v597_v38  ;;  %v656_v59 = vsel %vm1738_vm4, %v649_v14, 0.0  ;;  %v657_v56 = vsel %vm1750_vm8, %v646_v63, 0.0 }
 0x184   : > { %v731_v6 = vpop.permute.xlu0 %730  ;;  %v791_v5 = vpop.permute.xlu1 %790  ;;  %v677_v34 = vmul.f32 %v1616_v1, %v656_v59  ;;  %v678_v62 = vmul.f32 %v1616_v1, %v657_v56  ;;  %v709_v1 = vmul.f32 %v1638_v9, %v1568_v51 }
 0x185   : > { %v623_v39 = vadd.f32 %v617_v31, %v561_v26  ;;  %v624_v49 = vadd.f32 %v618_v36, %v562_v47  ;;  %v737_v38 = vsel %vm2139_vm13, %v725_v40, %v731_v6  ;;  %v740_v35 = vsel %vm2139_vm13, %v731_v6, %v725_v40 }
 0x186   : > { %v708_v26 = vmul.f32 %v1638_v9, %v1548_v45  ;;  %v747_v31 = vsel %vm1743_vm6, %v737_v38, 0.0  ;;  %v748_v7 = vsel %vm1766_vm10, %v740_v35, 0.0  ;;  %v797_v45 = vsel %vm796_vm15, %v1723_v41, %v791_v5 }
 0x187   : > { %v683_v37 = vadd.f32 %v677_v34, %v623_v39  ;;  %v684_v10 = vadd.f32 %v678_v62, %v624_v49  ;;  %v800_v51 = vsel %vm796_vm15, %v791_v5, %v1723_v41  ;;  %v768_v36 = vmul.f32 %v1655_v15, %v747_v31 }
 0x188   : > { %v853_v30 = vpop.permute.xlu0 %852  ;;  %v913_v28 = vpop.permute.xlu1 %912  ;;  %v769_v47 = vmul.f32 %v1655_v15, %v748_v7  ;;  %v809_v56 = vsel %vm1738_vm4, %v797_v45, 0.0  ;;  %v810_v39 = vsel %vm1833_vm1, %v800_v51, 0.0  ;;  %vm918_vm13 = vcmp.lt.s32.totalorder %v1725_v42, 111 }
 0x189   : > { %v714_v6 = vadd.f32 %v708_v26, %v683_v37  ;;  %v715_v40 = vadd.f32 %v709_v1, %v684_v10  ;;  %v862_v59 = vsel %vm2140_vm0, %v853_v30, %v1727_v43  ;;  %v859_v15 = vsel %vm2140_vm0, %v1727_v43, %v853_v30  ;;  %vm1880_vm0 = vmand %vm441_vm14, %vm1766_vm10 }
 0x18a   : > { %v870_v62 = vsel %vm441_vm14, %v862_v59, 0.0  ;;  %v830_v37 = vmul.f32 %v1669_v19, %v809_v56  ;;  %v831_v10 = vmul.f32 %v1669_v19, %v810_v39  ;;  %v919_v38 = vsel %vm918_vm13, %v1729_v44, %v913_v28  ;;  %v1000_v19 = vld [vmem:[%s2129_s5] sm:$0xf] }
 0x18b   : > { %v774_v49 = vadd.f32 %v768_v36, %v714_v6  ;;  %v775_v5 = vadd.f32 %v769_v47, %v715_v40  ;;  %v922_v35 = vsel %vm918_vm13, %v913_v28, %v1729_v44  ;;  %v890_v31 = vmul.f32 %v1689_v23, %v859_v15 }
 0x18c   : > { %v452_v50 = vpop.permute.xlu0 %451  ;;  %v514_v20 = vpop.permute.xlu1 %513  ;;  %v891_v30 = vmul.f32 %v1689_v23, %v870_v62 }
 0x18d   : > { %v836_v26 = vadd.f32 %v830_v37, %v774_v49  ;;  %v837_v1 = vadd.f32 %v831_v10, %v775_v5  ;;  %v932_v49 = vsel %vm1880_vm0, %v922_v35, 0.0 }
 0x18f   : > { %v896_v56 = vadd.f32 %v890_v31, %v836_v26  ;;  %v897_v39 = vadd.f32 %v891_v30, %v837_v1 }
 0x190   : > { %v574_v48 = vpop.permute.xlu0 %573  ;;  %v1816_v54 = vpop.permute.xlu1 %635 }
 0x194   : > { %v1843_v9 = vpop.permute.xlu0 %786  ;;  %v1845_v14 = vpop.permute.xlu1 %726 }
 0x198   : > { %v1857_v41 = vpop.permute.xlu0 %908  ;;  %v1859_v34 = vpop.permute.xlu1 %848 }
 0x19c   : > { %v458_v43 = vpop.permute.xlu0 %457  ;;  %v520_v7 = vpop.permute.xlu1 %519 }
 0x19d   : > { %v463_v6 = vsel %vm461_vm5, %v452_v50, %v458_v43  ;;  %v466_v44 = vsel %vm461_vm5, %v458_v43, %v452_v50  ;;  %v525_v28 = vsel %vm523_vm3, %v514_v20, %v520_v7  ;;  %v528_v23 = vsel %vm523_vm3, %v520_v7, %v514_v20 }
 0x19e   : > { %v476_v40 = vsel %vm1758_vm9, %v466_v44, 0.0  ;;  %v477_v45 = vsel %vm1750_vm8, %v463_v6, 0.0  ;;  %v536_v51 = vsel %vm438_vm2, %v528_v23, 0.0  ;;  %v558_v36 = vmul.f32 %v1602_v60, %v525_v28 }
 0x19f   : > { %v497_v47 = vmul.f32 %v1590_v58, %v476_v40  ;;  %v498_v50 = vmul.f32 %v1590_v58, %v477_v45  ;;  %v557_v59 = vmul.f32 %v1602_v60, %v536_v51  ;;  %v931_v20 = vsel %vm1743_vm6, %v919_v38, 0.0 }
 0x1a0   : > { %v580_v5 = vpop.permute.xlu0 %579  ;;  %v642_v15 = vpop.permute.xlu1 %641  ;;  %v952_v43 = vmul.f32 %v1702_v27, %v931_v20  ;;  %v953_v7 = vmul.f32 %v1702_v27, %v932_v49  ;;  %v710_v51 = vmul.f32 %v1644_v11, %v1588_v57  ;;  %v711_v27 = vmul.f32 %v1644_v11, %v1618_v2 }
 0x1a1   : > { %v563_v62 = vadd.f32 %v557_v59, %v497_v47  ;;  %v564_v37 = vadd.f32 %v558_v36, %v498_v50  ;;  %v585_v10 = vsel %vm2142_vm7, %v574_v48, %v580_v5  ;;  %v588_v58 = vsel %vm2142_vm7, %v580_v5, %v574_v48 }
 0x1a2   : > { %v598_v60 = vsel %vm1774_vm11, %v588_v58, 0.0  ;;  %v599_v26 = vsel %vm1766_vm10, %v585_v10, 0.0  ;;  %v647_v38 = vsel %vm2141_vm12, %v1816_v54, %v642_v15  ;;  %v650_v35 = vsel %vm2141_vm12, %v642_v15, %v1816_v54 }
 0x1a3   : > { %v619_v1 = vmul.f32 %v1610_v0, %v598_v60  ;;  %v620_v31 = vmul.f32 %v1610_v0, %v599_v26  ;;  %v658_v48 = vsel %vm1738_vm4, %v650_v35, 0.0  ;;  %v659_v30 = vsel %vm1750_vm8, %v647_v38, 0.0 }
 0x1a4   : > { %v679_v6 = vmul.f32 %v1624_v3, %v658_v48  ;;  %v680_v44 = vmul.f32 %v1624_v3, %v659_v30  ;;  %v793_v28 = vpop.permute.xlu0 %792  ;;  %v733_v54 = vpop.permute.xlu1 %732  ;;  %vm2168_vm12 = vcmp.lt.s32.totalorder %v1725_v42, 127  ;;  %v958_v47 = vadd.f32 %v952_v43, %v896_v56 }
 0x1a5   : > { %v625_v23 = vadd.f32 %v619_v1, %v563_v62  ;;  %v626_v40 = vadd.f32 %v620_v31, %v564_v37  ;;  %v798_v0 = vsel %vm796_vm15, %v1843_v9, %v793_v28  ;;  %v801_v45 = vsel %vm796_vm15, %v793_v28, %v1843_v9  ;;  %vm2169_vm7 = vmmov %vm2168_vm12 }
 0x1a6   : > { %v738_v3 = vsel %vm2168_vm12, %v1845_v14, %v733_v54  ;;  %v741_v36 = vsel %vm2169_vm7, %v733_v54, %v1845_v14  ;;  %v959_v20 = vadd.f32 %v953_v7, %v897_v39  ;;  %v811_v9 = vsel %vm1738_vm4, %v798_v0, 0.0 }
 0x1a7   : > { %v685_v50 = vadd.f32 %v679_v6, %v625_v23  ;;  %v686_v59 = vadd.f32 %v680_v44, %v626_v40  ;;  %v812_v57 = vsel %vm1833_vm1, %v801_v45, 0.0  ;;  %v749_v2 = vsel %vm1743_vm6, %v738_v3, 0.0 }
 0x1a8   : > { %v750_v11 = vsel %vm1766_vm10, %v741_v36, 0.0  ;;  %v915_v49 = vpop.permute.xlu0 %914  ;;  %v855_v5 = vpop.permute.xlu1 %854  ;;  %v770_v56 = vmul.f32 %v1657_v16, %v749_v2  ;;  %vm2170_vm7 = vcmp.lt.s32.totalorder %v1725_v42, 112  ;;  %v832_v60 = vmul.f32 %v1677_v21, %v811_v9 }
 0x1a9   : > { %v716_v15 = vadd.f32 %v710_v51, %v685_v50  ;;  %v717_v14 = vadd.f32 %v711_v27, %v686_v59  ;;  %v771_v39 = vmul.f32 %v1657_v16, %v750_v11  ;;  %v920_v62 = vsel %vm918_vm13, %v1857_v41, %v915_v49  ;;  %vm2171_vm12 = vmmov %vm2170_vm7 }
 0x1aa   : > { %v923_v37 = vsel %vm918_vm13, %v915_v49, %v1857_v41  ;;  %v860_v10 = vsel %vm2170_vm7, %v1859_v34, %v855_v5  ;;  %v863_v58 = vsel %vm2171_vm12, %v855_v5, %v1859_v34  ;;  %v833_v16 = vmul.f32 %v1677_v21, %v812_v57 }
 0x1ab   : > { %v776_v26 = vadd.f32 %v770_v56, %v716_v15  ;;  %v777_v38 = vadd.f32 %v771_v39, %v717_v14  ;;  %v933_v35 = vsel %vm1743_vm6, %v920_v62, 0.0  ;;  %v934_v41 = vsel %vm1880_vm0, %v923_v37, 0.0 }
 0x1ac   : > { %v872_v1 = vsel %vm441_vm14, %v863_v58, 0.0  ;;  %v576_v31 = vpop.permute.xlu0 %575  ;;  %v454_v48 = vpop.permute.xlu1 %453  ;;  %v892_v34 = vmul.f32 %v1691_v24, %v860_v10  ;;  %v983_v21 = vadd.f32 %v1717_v32, %v959_v20  ;;  %v982_v6 = vadd.f32 %v1717_v32, %v958_v47 }
 0x1ad   : > { %v838_v30 = vadd.f32 %v832_v60, %v776_v26  ;;  %v839_v43 = vadd.f32 %v833_v16, %v777_v38  ;;  %v893_v7 = vmul.f32 %v1691_v24, %v872_v1  ;;  %v954_v44 = vmul.f32 %v1711_v29, %v933_v35 }
 0x1ae   : > { %v955_v28 = vmul.f32 %v1711_v29, %v934_v41  ;;  %v989_v3 = vmax.f32 %v983_v21, 0.0  ;;  %v988_v36 = vmax.f32 %v982_v6, 0.0  ;;  %vm2172_vm7 = vcmp.lt.s32.totalorder %v1725_v42, 15 }
 0x1af   : > { %v898_v54 = vadd.f32 %v892_v34, %v838_v30  ;;  %v899_v23 = vadd.f32 %v893_v7, %v839_v43 }
 0x1b0   : > { %v1982_v40 = vpop.permute.xlu0 %788  ;;  %v516_v0 = vpop.permute.xlu1 %515  ;;  %v995_v20 = vmin.f32 %v989_v3, 6.0  ;;  %v994_v9 = vmin.f32 %v988_v36, 6.0  ;;  %v712_v3 = vmul.f32 %v1679_v22, %v1648_v13 }
 0x1b1   : > { %v961_v45 = vadd.f32 %v955_v28, %v899_v23  ;;  %v960_v51 = vadd.f32 %v954_v44, %v898_v54 }
 0x1b3   : > { %v985_v27 = vadd.f32 %v1719_v33, %v961_v45  ;;  %v984_v24 = vadd.f32 %v1719_v33, %v960_v51 }
 0x1b4   : > { %v1986_v50 = vpop.permute.xlu0 %850  ;;  %v638_v32 = vpop.permute.xlu1 %637 }
 0x1b5   : > { %v991_v47 = vmax.f32 %v985_v27, 0.0  ;;  %v990_v59 = vmax.f32 %v984_v24, 0.0  ;;  %v2178_v24 = vld [vmem:[#allocation7_spill] sm:$0xff] }
 0x1b7   : > { %v997_v29 = vmin.f32 %v991_v47, 6.0  ;;  %v996_v57 = vmin.f32 %v990_v59, 6.0 }
 0x1b8   : > { %v460_v2 = vpop.permute.xlu0 %459  ;;  %v729_v11 = vpop.permute.xlu1 %728 }
 0x1b9   : > { %v1208_v49 = vpack.c.bf16 %v997_v29, %v995_v20  ;;  %v1210_v5 = vpack.c.bf16 %v996_v57, %v994_v9  ;;  %v464_v15 = vsel %vm461_vm5, %v454_v48, %v460_v2  ;;  %v467_v33 = vsel %vm461_vm5, %v460_v2, %v454_v48  ;;  %vm2173_vm5 = vmmov %vm2172_vm7  ;;  %v2179_v20 = vld [vmem:[#allocation8_spill] sm:$0xff] }
 0x1ba   : > { %v478_v58 = vsel %vm1758_vm9, %v467_v33, 0.0  ;;  %v479_v60 = vsel %vm1750_vm8, %v464_v15, 0.0  ;;  %vm2176_vm9 = vcmp.lt.s32.totalorder %v1725_v42, 127 }
 0x1bb   : > { %1209 = vmatprep.subr.bf16.mxu1 %v1208_v49  ;;  %v499_v1 = vmul.f32 %v1626_v4, %v478_v58  ;;  %v500_v48 = vmul.f32 %v1626_v4, %v479_v60  ;;  %v2181_v49 = vld [vmem:[#allocation9_spill] sm:$0xff] }
 0x1bc   : > { %v522_v14 = vpop.permute.xlu0 %521  ;;  %v582_v56 = vpop.permute.xlu1 %581  ;;  %1211 = vmatpush1.bf16.msra.mxu1 %v1210_v5 }
 0x1bd   : > { %v526_v39 = vsel %vm523_vm3, %v516_v0, %v522_v14  ;;  %v529_v62 = vsel %vm523_vm3, %v522_v14, %v516_v0  ;;  %v586_v10 = vsel %vm2172_vm7, %v576_v31, %v582_v56  ;;  %v589_v38 = vsel %vm2173_vm5, %v582_v56, %v576_v31 }
 0x1be   : > { %v538_v37 = vsel %vm438_vm2, %v529_v62, 0.0  ;;  %v560_v26 = vmul.f32 %v1632_v8, %v526_v39  ;;  %v601_v41 = vsel %vm1766_vm10, %v586_v10, 0.0  ;;  %vm2174_vm2 = vcmp.lt.s32.totalorder %v1725_v42, 1  ;;  %v2183_v62 = vld [vmem:[#allocation10_spill] sm:$0xff] }
 0x1bf   : > { %v559_v16 = vmul.f32 %v1632_v8, %v538_v37  ;;  %vm2175_vm3 = vmmov %vm2174_vm2  ;;  %v600_v8 = vsel %vm1774_vm11, %v589_v38, 0.0  ;;  %v622_v31 = vmul.f32 %v1646_v12, %v601_v41  ;;  %v2184_v38 = vld [vmem:[#allocation11_spill] sm:$0xff] }
 0x1c0   : > { %v644_v35 = vpop.permute.xlu0 %643  ;;  %v566_v34 = vadd.f32 %v560_v26, %v500_v48  ;;  %v621_v4 = vmul.f32 %v1646_v12, %v600_v8  ;;  %vm2177_vm11 = vmmov %vm2176_vm9  ;;  %v795_v45 = vpop.permute.xlu1 %794 }
 0x1c1   : > { %v648_v61 = vsel %vm2174_vm2, %v638_v32, %v644_v35  ;;  %v651_v30 = vsel %vm2175_vm3, %v644_v35, %v638_v32  ;;  %v565_v43 = vadd.f32 %v559_v16, %v499_v1  ;;  %v799_v36 = vsel %vm796_vm15, %v1982_v40, %v795_v45 }
 0x1c2   : > { %v660_v7 = vsel %vm1738_vm4, %v651_v30, 0.0  ;;  %v661_v21 = vsel %vm1750_vm8, %v648_v61, 0.0  ;;  %v628_v28 = vadd.f32 %v622_v31, %v566_v34  ;;  %v802_v32 = vsel %vm796_vm15, %v795_v45, %v1982_v40  ;;  %vm2180_vm8 = vmmov %vm2171_vm12 }
 0x1c3   : > { %v627_v44 = vadd.f32 %v621_v4, %v565_v43  ;;  %v681_v54 = vmul.f32 %v1667_v18, %v660_v7  ;;  %v682_v25 = vmul.f32 %v1667_v18, %v661_v21  ;;  %v713_v18 = vmul.f32 %v1679_v22, %v2178_v24 }
 0x1c4   : > { %v735_v6 = vpop.permute.xlu0 %734  ;;  %v857_v9 = vpop.permute.xlu1 %856  ;;  %v813_v13 = vsel %vm1738_vm4, %v799_v36, 0.0  ;;  %v814_v22 = vsel %vm1833_vm1, %v802_v32, 0.0  ;;  %vm1007_vm4 = vcmask 195584  }
 0x1c5   : > { %v739_v23 = vsel %vm2176_vm9, %v729_v11, %v735_v6  ;;  %v742_v0 = vsel %vm2177_vm11, %v735_v6, %v729_v11  ;;  %v687_v51 = vadd.f32 %v681_v54, %v627_v44  ;;  %v688_v27 = vadd.f32 %v682_v25, %v628_v28  ;;  %v2185_v6 = vld [vmem:[#allocation5_spill] sm:$0xff]  ;;  %v2186_v28 = vld [vmem:[#allocation6_spill] sm:$0xff] }
 0x1c6   : > { %v751_v55 = vsel %vm1743_vm6, %v739_v23, 0.0  ;;  %v752_v12 = vsel %vm1766_vm10, %v742_v0, 0.0  ;;  %v864_v11 = vsel %vm2180_vm8, %v857_v9, %v1986_v50  ;;  %v834_v5 = vmul.f32 %v2181_v49, %v813_v13  ;;  %vm2182_vm10 = vmmov %vm2180_vm8 }
 0x1c7   : > { %v718_v47 = vadd.f32 %v712_v3, %v687_v51  ;;  %v719_v59 = vadd.f32 %v713_v18, %v688_v27  ;;  %v772_v29 = vmul.f32 %v2179_v20, %v751_v55  ;;  %v773_v17 = vmul.f32 %v2179_v20, %v752_v12 }
 0x1c8   : > { %v835_v15 = vmul.f32 %v2181_v49, %v814_v22  ;;  %v861_v33 = vsel %vm2182_vm10, %v1986_v50, %v857_v9  ;;  %v874_v52 = vsel %vm441_vm14, %v864_v11, 0.0  ;;  %v911_v56 = vpop.permute.xlu1 %910 }
 0x1c9   : > { %v778_v57 = vadd.f32 %v772_v29, %v718_v47  ;;  %v779_v2 = vadd.f32 %v773_v17, %v719_v59  ;;  %v894_v37 = vmul.f32 %v2183_v62, %v861_v33  ;;  %v895_v10 = vmul.f32 %v2183_v62, %v874_v52 }
 0x1cb   : > { %v840_v63 = vadd.f32 %v834_v5, %v778_v57  ;;  %v841_v14 = vadd.f32 %v835_v15, %v779_v2 }
 0x1cd   : > { %v900_v16 = vadd.f32 %v894_v37, %v840_v63  ;;  %v901_v26 = vadd.f32 %v895_v10, %v841_v14 }
 0x1d5   : > { %v980_v40 = vpop.permute.xlu0 %979 }
 0x1d9   : > { %v917_v39 = vpop.permute.xlu0 %916  ;;  %v1005_v34 = vpop.permute.xlu1 %1004 }
 0x1da   : > { %v921_v58 = vsel %vm918_vm13, %v911_v56, %v917_v39  ;;  %v924_v60 = vsel %vm918_vm13, %v917_v39, %v911_v56 }
 0x1db   : > { %v935_v50 = vsel %vm1743_vm6, %v921_v58, 0.0  ;;  %v936_v46 = vsel %vm1880_vm0, %v924_v60, 0.0 }
 0x1dc   : > { %v956_v35 = vmul.f32 %v2184_v38, %v935_v50  ;;  %v957_v41 = vmul.f32 %v2184_v38, %v936_v46 }
 0x1de   : > { %v962_v1 = vadd.f32 %v956_v35, %v900_v16  ;;  %v963_v48 = vadd.f32 %v957_v41, %v901_v26 }
 0x1e0   : > { %v987_v61 = vadd.f32 %v980_v40, %v963_v48  ;;  %v986_v30 = vadd.f32 %v980_v40, %v962_v1 }
 0x1e2   : > { %v993_v8 = vmax.f32 %v987_v61, 0.0  ;;  %v992_v42 = vmax.f32 %v986_v30, 0.0 }
 0x1e4   : > { %v999_v43 = vmin.f32 %v993_v8, 6.0  ;;  %v998_v53 = vmin.f32 %v992_v42, 6.0 }
 0x1e6   : > { %1015 = vmatprep.subr.mxu1 %v999_v43 }
 0x1e7   : > { %1016 = vmatpush1.msra.mxu1 %v998_v53 }
 0x1e8   : > { %1200 = vmatmul.mubr.msk.f32.vlgmr.msra.gmra.mrb[0].mxu1 %vm1007_vm4, %v1000_v19 }
 0x2bb   : > { %v1077_v31 = vpop.f32.mrb[0].mxu1 }
 0x2bc   : > { %v1078_v7 = vadd.f32 %v1077_v31, %v1005_v34  ;;  %v1079_v21 = vpop.f32.mrb[1].mxu1 }
 0x2bd   : > { %v1080_v4 = vadd.f32 %v1079_v21, %v1005_v34 }
 0x2be   : > { %v1083_v44 = vadd.f32 %v1078_v7, %v2185_v6 }
 0x2bf   : > { %v1084_v54 = vadd.f32 %v1080_v4, %v2186_v28 }
 0x2c1   : > { %v1087_v25 = vcombine.low %v1083_v44, %v1084_v54 }
 0x2c3   : > { %1089 = vst [vmem:[%s271_s21] sm:$0xff] %v1087_v25 }
 0x2c4   : > { %1277 = shalt.err (!%p1274_p3)
}
 0x2c5   : > { %s1278_s16 = scalar_lea.hbm %s2082_s8, 128  ;;  %s1282_s19 = scalar_lea.hbm %s2131_s7, 256 }
 0x2c6   : > { %p1279_p4 = scmp.ne.s32.totalorder %s2082_s8, %s1278_s16  ;;  %p1283_p9 = scmp.lt.u32.totalorder %s2082_s8, %s2131_s7 }
 0x2c7   : > { %p1284_p10 = scmp.lt.u32.totalorder %s1282_s19, %s1278_s16  ;;  %p1286_p12 = scmp.lt.u32.totalorder %s1278_s16, %s2082_s8 }
 0x2c8   : > { %p1280_p7 = pnand %p1279_p4, %p1417_p5 }
 0x2c9   : > { %p1285_p11 = por %p1284_p10, %p1283_p9 }
 0x2ca   : > { %p1281_p8 = pneg %p1280_p7 }
 0x2cb   : > { %p1287_p13 = por %p1286_p12, %p1285_p11 }
 0x2cd   : > { %p1288_p0 = pnand %p1287_p13, %p1281_p8 }
 0x2cf   : > { %1291 = shalt.err (!%p1288_p0)
}
 0x2d0   : > { %1212 = dma.vmem_to_hbm [thread:$0]  (%p1417_p5), %s2084_s22, 128, %s2082_s8, %s1091_s9  }
 0x2d1 PF: > { %p1218_p1 = scmp.ge.s32.totalorder %s1326_s27, 2  ;;  %s1117_s23 = sand.u32 1, %s1314_s24  }
 0x2d2   : > { %s1118_s29 = scalar_lea.sflag [#allocation3], %s1117_s23 }
 0x2d3   : > { %p1215_p2 = pnand %p1218_p1, %p1421_p6 }
 0x2d5   : > { %1309 = dma.done.wait (!%p1215_p2), %s1118_s29, 128  }
 0x2d6   : > { %1311 = vsyncadd (!%p1215_p2), %s1118_s29, 4294967168  ;;  %p17_p3 = scmp.ge.s32.totalorder %s1404_s30, 4   ;;  %s2187_s24 = smov %s1318_s25 }
 0x2d7   : > { %s2188_s25 = smov %s1322_s26  ;;  %s2189_s26 = smov %s1415_s10 }
 0x2d8   : > { %s2190_s27 = smov %s1404_s30  ;;  %19 = sbr.rel (!%p17_p3) target bundleno = 3 (0x3), region = 91 }
 0x2df   :  { %1123 = vsyncpa [#allocation3], 1 }
 0x2e0   :  { %1125 = vsyncpa [#allocation3 + $0x1], 1 }

</bundles_post_ra>
